<compile_context>
chip_gen: v7x
topology: tpu7x:2x2x1
jax: 0.10.0
libtpu: 0.0.40
codegen_flags: <defaults>
</compile_context>

<pallas_src>
import functools

import jax
import jax.numpy as jnp
from jax.experimental import pallas as pl
from jax.experimental.pallas import tpu as pltpu


NUM_HEADS = 3
OUT_DIMS = (1, 4, 2)      # chern, z2, mirror_chern
OUT_PAD = 8               # per-head slot width in the packed output slab


def _round_up(x, m):
    return ((x + m - 1) // m) * m


# --------------------------------------------------------------------------
# Kernel: all three MLP heads fused along the lane axis.
# --------------------------------------------------------------------------
def _fused_heads_kernel(x_ref, w1_ref, w2_ref, w3_ref, vec_ref, o_ref,
                        *, num_heads, hidden):
    bt = x_ref.shape[0]
    h2_width = w2_ref.shape[1]            # 3 * H/2
    out_width = w3_ref.shape[1]           # 3 * OUT_PAD

    # f32 bias / affine slab (rows: b1, gamma, beta, b2(pad), b3(pad)).
    b1 = vec_ref[0:1, :]
    gamma = vec_ref[1:2, :]
    beta = vec_ref[2:3, :]
    b2 = vec_ref[3:4, :h2_width]
    b3 = vec_ref[4:5, :out_width]

    # bf16 operands for the MXU; accumulation and LN math stay f32.
    x_bf = x_ref[...].astype(jnp.bfloat16)                    # (Bt, D)

    # ---- Layer 1: fused (Bt, D) @ (D, 3H) ----
    z = jnp.dot(x_bf, w1_ref[...],
                preferred_element_type=jnp.float32) + b1      # (Bt, 3H) f32

    # ---- Per-head LayerNorm stats, single pass (sum, sum of squares) ----
    z_sq = z * z
    inv_h = 1.0 / float(hidden)
    mu_parts, var_parts = [], []
    for h in range(num_heads):                                # static unroll
        seg = slice(h * hidden, (h + 1) * hidden)
        mu = jnp.sum(z[:, seg], axis=-1, keepdims=True) * inv_h
        ez2 = jnp.sum(z_sq[:, seg], axis=-1, keepdims=True) * inv_h
        var = ez2 - mu * mu
        mu_parts.append(jnp.broadcast_to(mu, (bt, hidden)))
        var_parts.append(jnp.broadcast_to(var, (bt, hidden)))
    mu_all = jnp.concatenate(mu_parts, axis=-1)               # (Bt, 3H)
    var_all = jnp.concatenate(var_parts, axis=-1)              # (Bt, 3H)

    # ---- LN affine + ReLU + bf16 cast, once at full (192-lane) width ----
    zn = (z - mu_all) * jax.lax.rsqrt(var_all + 1e-5) * gamma + beta
    zn = jnp.maximum(zn, 0.0).astype(jnp.bfloat16)

    # ---- Layer 2: block-diagonal (3H, 3*H/2) + ReLU ----
    y = jnp.dot(zn, w2_ref[...],
                preferred_element_type=jnp.float32) + b2      # (Bt, 96) f32
    y = jnp.maximum(y, 0.0).astype(jnp.bfloat16)

    # ---- Layer 3: block-diagonal (3*H/2, 3*OUT_PAD) -> packed output ----
    out = jnp.dot(y, w3_ref[...],
                  preferred_element_type=jnp.float32) + b3    # (Bt, 24) f32
    o_ref[...] = out.astype(o_ref.dtype)


# --------------------------------------------------------------------------
# Wrapper: batch tiling + pallas_call.
# --------------------------------------------------------------------------
def _fused_forward(x, w1, w2, w3, vecs, *, max_block_b=4096, min_split_b=1024):
    """Run the fused 3-head extractor; returns packed [B, 3*OUT_PAD] f32."""
    B, D = x.shape
    out_width = w3.shape[1]
    hidden = w1.shape[1] // NUM_HEADS

    # Batch tiling: single full-batch tile at small B; at large B use big
    # (>=2048-row) tiles but keep >= 2 grid steps so the "parallel" axis can
    # shard across v7x's two TensorCores.
    if B <= min_split_b:
        bb, grid_b = B, 1
    else:
        bb = min(max_block_b, _round_up(pl.cdiv(B, 2), 8))
        grid_b = pl.cdiv(B, bb)           # partial tail tile masked by Pallas

    const2 = lambda i: (0, 0)             # weights resident across batch tiles
    kernel = functools.partial(_fused_heads_kernel,
                               num_heads=NUM_HEADS, hidden=hidden)

    return pl.pallas_call(
        kernel,
        out_shape=jax.ShapeDtypeStruct((B, out_width), jnp.float32),
        grid=(grid_b,),
        in_specs=[
            pl.BlockSpec((bb, D), lambda i: (i, 0)),
            pl.BlockSpec(w1.shape, const2),
            pl.BlockSpec(w2.shape, const2),
            pl.BlockSpec(w3.shape, const2),
            pl.BlockSpec(vecs.shape, const2),
        ],
        out_specs=pl.BlockSpec((bb, out_width), lambda i: (i, 0)),
        compiler_params=pltpu.CompilerParams(
            dimension_semantics=("parallel",)),
    )(x, w1, w2, w3, vecs)


@jax.jit
def _jit_forward(x, w1, w2, w3, vecs):
    return _fused_forward(x, w1, w2, w3, vecs)


# --------------------------------------------------------------------------
# Parameter init (PyTorch nn.Linear / nn.LayerNorm defaults) + packing.
# --------------------------------------------------------------------------
def _init_linear(key, fan_in, fan_out):
    kw, kb = jax.random.split(key)
    bound = 1.0 / jnp.sqrt(jnp.float32(fan_in))
    w = jax.random.uniform(kw, (fan_in, fan_out), jnp.float32, -bound, bound)
    b = jax.random.uniform(kb, (1, fan_out), jnp.float32, -bound, bound)
    return w, b


def init_head_params(key, input_dim, hidden_dim, out_dim):
    k1, k2, k3 = jax.random.split(key, 3)
    w1, b1 = _init_linear(k1, input_dim, hidden_dim)
    w2, b2 = _init_linear(k2, hidden_dim, hidden_dim // 2)
    w3, b3 = _init_linear(k3, hidden_dim // 2, out_dim)
    return {
        "w1": w1, "b1": b1,
        "gamma": jnp.ones((1, hidden_dim), jnp.float32),
        "beta": jnp.zeros((1, hidden_dim), jnp.float32),
        "w2": w2, "b2": b2,
        "w3": w3, "b3": b3,
    }


def _pack_params(heads, hidden_dim):
    """Pack 3 heads into fused/block-diagonal kernel inputs."""
    h2 = hidden_dim // 2
    nh = len(heads)
    fused_h = nh * hidden_dim
    fused_h2 = nh * h2
    fused_out = nh * OUT_PAD

    # W1: concat along output dim -> (D, 3H).
    w1 = jnp.concatenate([p["w1"] for p in heads], axis=1).astype(jnp.bfloat16)

    # W2: block-diagonal (3H, 3*H/2).
    w2 = jnp.zeros((fused_h, fused_h2), jnp.float32)
    for i, p in enumerate(heads):
        w2 = w2.at[i * hidden_dim:(i + 1) * hidden_dim,
                   i * h2:(i + 1) * h2].set(p["w2"])
    w2 = w2.astype(jnp.bfloat16)

    # W3: block-diagonal (3*H/2, 3*OUT_PAD), per-head out padded to OUT_PAD.
    w3 = jnp.zeros((fused_h2, fused_out), jnp.float32)
    for i, (p, od) in enumerate(zip(heads, OUT_DIMS)):
        w3 = w3.at[i * h2:(i + 1) * h2,
                   i * OUT_PAD:i * OUT_PAD + od].set(p["w3"])
    w3 = w3.astype(jnp.bfloat16)

    # f32 vector slab (5, 3H): b1, gamma, beta, b2(pad->3H), b3(pad->3H).
    b1 = jnp.concatenate([p["b1"] for p in heads], axis=1)
    gamma = jnp.concatenate([p["gamma"] for p in heads], axis=1)
    beta = jnp.concatenate([p["beta"] for p in heads], axis=1)
    b2 = jnp.concatenate([p["b2"] for p in heads], axis=1)
    b2 = jnp.pad(b2, ((0, 0), (0, fused_h - fused_h2)))
    b3 = jnp.concatenate(
        [jnp.pad(p["b3"], ((0, 0), (0, OUT_PAD - od)))
         for p, od in zip(heads, OUT_DIMS)], axis=1)
    b3 = jnp.pad(b3, ((0, 0), (0, fused_h - fused_out)))
    vecs = jnp.concatenate([b1, gamma, beta, b2, b3], axis=0).astype(jnp.float32)
    return w1, w2, w3, vecs


class TopologicalInvariantExtractorPallas:
    """JAX/Pallas port of TopologicalInvariantExtractor (single fused kernel)."""

    def __init__(self, input_dim: int, hidden_dim: int = 64, *, seed: int = 0):
        k = jax.random.PRNGKey(seed)
        kc, kz, km = jax.random.split(k, 3)
        self.hidden_dim = hidden_dim
        # Unpacked f32 params kept for the pure-JAX reference check.
        self.chern_params = init_head_params(kc, input_dim, hidden_dim, 1)
        self.z2_params = init_head_params(kz, input_dim, hidden_dim, 4)
        self.mirror_params = init_head_params(km, input_dim, hidden_dim, 2)
        self._w1, self._w2, self._w3, self._vecs = _pack_params(
            [self.chern_params, self.z2_params, self.mirror_params], hidden_dim)

    def __call__(self, band_features):
        packed = _jit_forward(band_features,
                              self._w1, self._w2, self._w3, self._vecs)
        op = OUT_PAD
        return {
            "chern_invariant": packed[:, 0:OUT_DIMS[0]],
            "z2_invariants": packed[:, op:op + OUT_DIMS[1]],
            "mirror_chern": packed[:, 2 * op:2 * op + OUT_DIMS[2]],
        }


# --------------------------------------------------------------------------
# Pure-JAX f32 reference (correctness check; kernel uses bf16 MXU operands).
# --------------------------------------------------------------------------
def _reference(x, params):
    h = x @ params["w1"] + params["b1"]
    mu = jnp.mean(h, axis=-1, keepdims=True)
    var = jnp.mean((h - mu) ** 2, axis=-1, keepdims=True)
    h = (h - mu) / jnp.sqrt(var + 1e-5) * params["gamma"] + params["beta"]
    h = jnp.maximum(h, 0.0)
    h2 = jnp.maximum(h @ params["w2"] + params["b2"], 0.0)
    return h2 @ params["w3"] + params["b3"]


if __name__ == "__main__":
    batch, input_dim, hidden_dim = 4, 32, 64

    key = jax.random.PRNGKey(0)
    band_features = jax.random.normal(key, (batch, input_dim), jnp.float32)

    model = TopologicalInvariantExtractorPallas(input_dim, hidden_dim, seed=0)
    out = model(band_features)
    jax.block_until_ready(out)

    assert out["chern_invariant"].shape == (batch, 1)
    assert out["z2_invariants"].shape == (batch, 4)
    assert out["mirror_chern"].shape == (batch, 2)

    # Correctness vs pure-f32 reference (kernel matmuls are bf16 on the MXU,
    # so use a correspondingly relaxed tolerance).
    ref_chern = _reference(band_features, model.chern_params)
    ref_z2 = _reference(band_features, model.z2_params)
    ref_mirror = _reference(band_features, model.mirror_params)
    assert jnp.allclose(out["chern_invariant"], ref_chern, atol=2e-2, rtol=2e-2)
    assert jnp.allclose(out["z2_invariants"], ref_z2, atol=2e-2, rtol=2e-2)
    assert jnp.allclose(out["mirror_chern"], ref_mirror, atol=2e-2, rtol=2e-2)

    print("KERNEL_OK")
</pallas_src>

<mosaic_0001>
module attributes {stable_mosaic.version = 11 : i64} {
  func.func @_fused_heads_kernel(%arg0: i32, %arg1: memref<4x32xf32, #tpu.memory_space<vmem>>, %arg2: memref<32x192xbf16, #tpu.memory_space<vmem>>, %arg3: memref<192x96xbf16, #tpu.memory_space<vmem>>, %arg4: memref<96x24xbf16, #tpu.memory_space<vmem>>, %arg5: memref<5x192xf32, #tpu.memory_space<vmem>>, %arg6: memref<4x24xf32, #tpu.memory_space<vmem>>) attributes {dimension_semantics = [#tpu.dimension_semantics<parallel>], iteration_bounds = array<i64: 1>, scalar_prefetch = 0 : i64, scratch_operands = 0 : i64, tpu.core_type = #tpu.core_type<tc>, window_params = [{transform_indices = @transform_0, window_bounds = array<i64: 4, 32>}, {pipeline_mode = #tpu.pipeline_mode<synchronous>, transform_indices = @transform_1, window_bounds = array<i64: 32, 192>}, {pipeline_mode = #tpu.pipeline_mode<synchronous>, transform_indices = @transform_2, window_bounds = array<i64: 192, 96>}, {pipeline_mode = #tpu.pipeline_mode<synchronous>, transform_indices = @transform_3, window_bounds = array<i64: 96, 24>}, {pipeline_mode = #tpu.pipeline_mode<synchronous>, transform_indices = @transform_4, window_bounds = array<i64: 5, 192>}, {transform_indices = @transform_5, window_bounds = array<i64: 4, 24>}]} {
    %c0 = arith.constant 0 : index
    %c0_0 = arith.constant 0 : index
    %0 = vector.load %arg5[%c0, %c0_0] : memref<5x192xf32, #tpu.memory_space<vmem>>, vector<1x192xf32>
    %c1 = arith.constant 1 : index
    %c0_1 = arith.constant 0 : index
    %1 = vector.load %arg5[%c1, %c0_1] : memref<5x192xf32, #tpu.memory_space<vmem>>, vector<1x192xf32>
    %c2 = arith.constant 2 : index
    %c0_2 = arith.constant 0 : index
    %2 = vector.load %arg5[%c2, %c0_2] : memref<5x192xf32, #tpu.memory_space<vmem>>, vector<1x192xf32>
    %c3 = arith.constant 3 : index
    %c0_3 = arith.constant 0 : index
    %3 = vector.load %arg5[%c3, %c0_3] : memref<5x192xf32, #tpu.memory_space<vmem>>, vector<1x96xf32>
    %c4 = arith.constant 4 : index
    %c0_4 = arith.constant 0 : index
    %4 = vector.load %arg5[%c4, %c0_4] : memref<5x192xf32, #tpu.memory_space<vmem>>, vector<1x24xf32>
    %c0_5 = arith.constant 0 : index
    %c0_6 = arith.constant 0 : index
    %5 = vector.load %arg1[%c0_5, %c0_6] : memref<4x32xf32, #tpu.memory_space<vmem>>, vector<4x32xf32>
    %6 = arith.truncf %5 : vector<4x32xf32> to vector<4x32xbf16>
    %c0_7 = arith.constant 0 : index
    %c0_8 = arith.constant 0 : index
    %7 = vector.load %arg2[%c0_7, %c0_8] : memref<32x192xbf16, #tpu.memory_space<vmem>>, vector<32x192xbf16>
    %cst = arith.constant dense<0.000000e+00> : vector<4x192xf32>
    %8 = tpu.matmul %6, %7, %cst {dimension_numbers = #tpu.dot_dimension_numbers<[1], [0], [0], [1], [0, 0, 1, 1], [], []>} : vector<4x32xbf16>, vector<32x192xbf16>, vector<4x192xf32> -> vector<4x192xf32>
    %9 = vector.broadcast %0 : vector<1x192xf32> to vector<4x192xf32>
    %10 = arith.addf %8, %9 : vector<4x192xf32>
    %11 = arith.mulf %10, %10 : vector<4x192xf32>
    %12 = vector.extract_strided_slice %10 {offsets = [0, 0], sizes = [4, 64], strides = [1, 1]} : vector<4x192xf32> to vector<4x64xf32>
    %cst_9 = arith.constant dense<0.000000e+00> : vector<4xf32>
    %13 = vector.multi_reduction <add>, %12, %cst_9 [1] : vector<4x64xf32> to vector<4xf32>
    %14 = vector.shape_cast %13 : vector<4xf32> to vector<4x1xf32>
    %cst_10 = arith.constant 1.562500e-02 : f32
    %15 = vector.broadcast %cst_10 : f32 to vector<4x1xf32>
    %16 = arith.mulf %14, %15 : vector<4x1xf32>
    %17 = vector.extract_strided_slice %11 {offsets = [0, 0], sizes = [4, 64], strides = [1, 1]} : vector<4x192xf32> to vector<4x64xf32>
    %cst_11 = arith.constant dense<0.000000e+00> : vector<4xf32>
    %18 = vector.multi_reduction <add>, %17, %cst_11 [1] : vector<4x64xf32> to vector<4xf32>
    %19 = vector.shape_cast %18 : vector<4xf32> to vector<4x1xf32>
    %cst_12 = arith.constant 1.562500e-02 : f32
    %20 = vector.broadcast %cst_12 : f32 to vector<4x1xf32>
    %21 = arith.mulf %19, %20 : vector<4x1xf32>
    %22 = arith.mulf %16, %16 : vector<4x1xf32>
    %23 = arith.subf %21, %22 : vector<4x1xf32>
    %24 = vector.shape_cast %16 : vector<4x1xf32> to vector<4x1xf32>
    %25 = vector.broadcast %24 : vector<4x1xf32> to vector<4x64xf32>
    %26 = vector.shape_cast %23 : vector<4x1xf32> to vector<4x1xf32>
    %27 = vector.broadcast %26 : vector<4x1xf32> to vector<4x64xf32>
    %28 = vector.extract_strided_slice %10 {offsets = [0, 64], sizes = [4, 64], strides = [1, 1]} : vector<4x192xf32> to vector<4x64xf32>
    %cst_13 = arith.constant dense<0.000000e+00> : vector<4xf32>
    %29 = vector.multi_reduction <add>, %28, %cst_13 [1] : vector<4x64xf32> to vector<4xf32>
    %30 = vector.shape_cast %29 : vector<4xf32> to vector<4x1xf32>
    %cst_14 = arith.constant 1.562500e-02 : f32
    %31 = vector.broadcast %cst_14 : f32 to vector<4x1xf32>
    %32 = arith.mulf %30, %31 : vector<4x1xf32>
    %33 = vector.extract_strided_slice %11 {offsets = [0, 64], sizes = [4, 64], strides = [1, 1]} : vector<4x192xf32> to vector<4x64xf32>
    %cst_15 = arith.constant dense<0.000000e+00> : vector<4xf32>
    %34 = vector.multi_reduction <add>, %33, %cst_15 [1] : vector<4x64xf32> to vector<4xf32>
    %35 = vector.shape_cast %34 : vector<4xf32> to vector<4x1xf32>
    %cst_16 = arith.constant 1.562500e-02 : f32
    %36 = vector.broadcast %cst_16 : f32 to vector<4x1xf32>
    %37 = arith.mulf %35, %36 : vector<4x1xf32>
    %38 = arith.mulf %32, %32 : vector<4x1xf32>
    %39 = arith.subf %37, %38 : vector<4x1xf32>
    %40 = vector.shape_cast %32 : vector<4x1xf32> to vector<4x1xf32>
    %41 = vector.broadcast %40 : vector<4x1xf32> to vector<4x64xf32>
    %42 = vector.shape_cast %39 : vector<4x1xf32> to vector<4x1xf32>
    %43 = vector.broadcast %42 : vector<4x1xf32> to vector<4x64xf32>
    %44 = vector.extract_strided_slice %10 {offsets = [0, 128], sizes = [4, 64], strides = [1, 1]} : vector<4x192xf32> to vector<4x64xf32>
    %cst_17 = arith.constant dense<0.000000e+00> : vector<4xf32>
    %45 = vector.multi_reduction <add>, %44, %cst_17 [1] : vector<4x64xf32> to vector<4xf32>
    %46 = vector.shape_cast %45 : vector<4xf32> to vector<4x1xf32>
    %cst_18 = arith.constant 1.562500e-02 : f32
    %47 = vector.broadcast %cst_18 : f32 to vector<4x1xf32>
    %48 = arith.mulf %46, %47 : vector<4x1xf32>
    %49 = vector.extract_strided_slice %11 {offsets = [0, 128], sizes = [4, 64], strides = [1, 1]} : vector<4x192xf32> to vector<4x64xf32>
    %cst_19 = arith.constant dense<0.000000e+00> : vector<4xf32>
    %50 = vector.multi_reduction <add>, %49, %cst_19 [1] : vector<4x64xf32> to vector<4xf32>
    %51 = vector.shape_cast %50 : vector<4xf32> to vector<4x1xf32>
    %cst_20 = arith.constant 1.562500e-02 : f32
    %52 = vector.broadcast %cst_20 : f32 to vector<4x1xf32>
    %53 = arith.mulf %51, %52 : vector<4x1xf32>
    %54 = arith.mulf %48, %48 : vector<4x1xf32>
    %55 = arith.subf %53, %54 : vector<4x1xf32>
    %56 = vector.shape_cast %48 : vector<4x1xf32> to vector<4x1xf32>
    %57 = vector.broadcast %56 : vector<4x1xf32> to vector<4x64xf32>
    %58 = vector.shape_cast %55 : vector<4x1xf32> to vector<4x1xf32>
    %59 = vector.broadcast %58 : vector<4x1xf32> to vector<4x64xf32>
    %60 = tpu.concatenate %25, %41, %57 in 1 : vector<4x64xf32>, vector<4x64xf32>, vector<4x64xf32> -> vector<4x192xf32>
    %61 = tpu.concatenate %27, %43, %59 in 1 : vector<4x64xf32>, vector<4x64xf32>, vector<4x64xf32> -> vector<4x192xf32>
    %62 = arith.subf %10, %60 : vector<4x192xf32>
    %cst_21 = arith.constant 9.99999974E-6 : f32
    %63 = vector.broadcast %cst_21 : f32 to vector<4x192xf32>
    %64 = arith.addf %61, %63 : vector<4x192xf32>
    %65 = math.rsqrt %64 : vector<4x192xf32>
    %66 = arith.mulf %62, %65 : vector<4x192xf32>
    %67 = vector.broadcast %1 : vector<1x192xf32> to vector<4x192xf32>
    %68 = arith.mulf %66, %67 : vector<4x192xf32>
    %69 = vector.broadcast %2 : vector<1x192xf32> to vector<4x192xf32>
    %70 = arith.addf %68, %69 : vector<4x192xf32>
    %cst_22 = arith.constant 0.000000e+00 : f32
    %71 = vector.broadcast %cst_22 : f32 to vector<4x192xf32>
    %72 = arith.maximumf %70, %71 : vector<4x192xf32>
    %73 = arith.truncf %72 : vector<4x192xf32> to vector<4x192xbf16>
    %c0_23 = arith.constant 0 : index
    %c0_24 = arith.constant 0 : index
    %74 = vector.load %arg3[%c0_23, %c0_24] : memref<192x96xbf16, #tpu.memory_space<vmem>>, vector<192x96xbf16>
    %cst_25 = arith.constant dense<0.000000e+00> : vector<4x96xf32>
    %75 = tpu.matmul %73, %74, %cst_25 {dimension_numbers = #tpu.dot_dimension_numbers<[1], [0], [0], [1], [0, 0, 1, 1], [], []>} : vector<4x192xbf16>, vector<192x96xbf16>, vector<4x96xf32> -> vector<4x96xf32>
    %76 = vector.broadcast %3 : vector<1x96xf32> to vector<4x96xf32>
    %77 = arith.addf %75, %76 : vector<4x96xf32>
    %cst_26 = arith.constant 0.000000e+00 : f32
    %78 = vector.broadcast %cst_26 : f32 to vector<4x96xf32>
    %79 = arith.maximumf %77, %78 : vector<4x96xf32>
    %80 = arith.truncf %79 : vector<4x96xf32> to vector<4x96xbf16>
    %c0_27 = arith.constant 0 : index
    %c0_28 = arith.constant 0 : index
    %81 = vector.load %arg4[%c0_27, %c0_28] : memref<96x24xbf16, #tpu.memory_space<vmem>>, vector<96x24xbf16>
    %cst_29 = arith.constant dense<0.000000e+00> : vector<4x24xf32>
    %82 = tpu.matmul %80, %81, %cst_29 {dimension_numbers = #tpu.dot_dimension_numbers<[1], [0], [0], [1], [0, 0, 1, 1], [], []>} : vector<4x96xbf16>, vector<96x24xbf16>, vector<4x24xf32> -> vector<4x24xf32>
    %83 = vector.broadcast %4 : vector<1x24xf32> to vector<4x24xf32>
    %84 = arith.addf %82, %83 : vector<4x24xf32>
    %c0_30 = arith.constant 0 : index
    %c0_31 = arith.constant 0 : index
    %85 = vector.load %arg6[%c0_30, %c0_31] : memref<4x24xf32, #tpu.memory_space<vmem>>, vector<4x24xf32>
    tpu.vector_store %arg6[%c0_30, %c0_31], %84 {strides = array<i32>} : memref<4x24xf32, #tpu.memory_space<vmem>>, vector<4x24xf32>,
    return
  }
  func.func @transform_0(%arg0: i32) -> (i32, i32) {
    %c0_i32 = arith.constant 0 : i32
    %c0_i32_0 = arith.constant 0 : i32
    return %arg0, %c0_i32 : i32, i32
  }
  func.func @transform_1(%arg0: i32) -> (i32, i32) {
    %c0_i32 = arith.constant 0 : i32
    %c0_i32_0 = arith.constant 0 : i32
    %c0_i32_1 = arith.constant 0 : i32
    return %c0_i32, %c0_i32_0 : i32, i32
  }
  func.func @transform_2(%arg0: i32) -> (i32, i32) {
    %c0_i32 = arith.constant 0 : i32
    %c0_i32_0 = arith.constant 0 : i32
    %c0_i32_1 = arith.constant 0 : i32
    return %c0_i32, %c0_i32_0 : i32, i32
  }
  func.func @transform_3(%arg0: i32) -> (i32, i32) {
    %c0_i32 = arith.constant 0 : i32
    %c0_i32_0 = arith.constant 0 : i32
    %c0_i32_1 = arith.constant 0 : i32
    return %c0_i32, %c0_i32_0 : i32, i32
  }
  func.func @transform_4(%arg0: i32) -> (i32, i32) {
    %c0_i32 = arith.constant 0 : i32
    %c0_i32_0 = arith.constant 0 : i32
    %c0_i32_1 = arith.constant 0 : i32
    return %c0_i32, %c0_i32_0 : i32, i32
  }
  func.func @transform_5(%arg0: i32) -> (i32, i32) {
    %c0_i32 = arith.constant 0 : i32
    %c0_i32_0 = arith.constant 0 : i32
    return %arg0, %c0_i32 : i32, i32
  }
}

</mosaic_0001>

<bundles_post_ra>
// kernel: _jit_forward.1
= control target key start
LH: loop header
LB: loop body
LE: loop exit
PB: predicated region body
PF: predicated region fallthrough
CT: control target
= control target key end

     0   :  { %10 = vsyncpa [#allocation3], 0  ;;  %s755_s0 = inlined_call_operand.vmem [shape: f32[4,32], index: 0, kind: input, shape index: {}]   ;;  %s756_s1 = inlined_call_operand.vmem [shape: bf16[32,192], index: 1, kind: input, shape index: {}]   ;;  %s757_s2 = inlined_call_operand.hbm [shape: bf16[192,96], index: 2, kind: input, shape index: {}]   ;;  %s758_s3 = inlined_call_operand.vmem [shape: bf16[96,24], index: 3, kind: input, shape index: {}]   ;;  %s759_s4 = inlined_call_operand.vmem [shape: f32[5,192], index: 4, kind: input, shape index: {}]   ;;  %s760_s5 = inlined_call_operand.hbm [shape: f32[4,24], index: 5, kind: output, shape index: {}]  }
   0x1   :  { %11 = vsyncpa [#allocation4], 0  ;;  %s590_s18 = smov [#allocation2]   ;;  %s542_s22 = scalar_lea.hbm %s757_s2, 1536 }
   0x2   :  { %s21_s19 = sshll.u32 %s590_s18, 4  ;;  %p543_p0 = scmp.ne.s32.totalorder %s757_s2, %s542_s22  ;;  %s22_s19 = int_to_ptr.vmem [resolvable:$true] %s21_s19 }
   0x3   :  { %p546_p1 = scmp.lt.u32.totalorder %s542_s22, %s757_s2 }
   0x5   :  { %p548_p2 = pnand %p546_p1, %p543_p0 }
   0x7   :  { %551 = shalt.err (!%p548_p2)
}
   0x8   :  { %s552_s27 = scalar_lea.vmem %s22_s19, 1536  ;;  %p557_p4 = scmp.lt.s32.totalorder %s22_s19, %s22_s19 }
   0x9   :  { %p553_p3 = scmp.ne.s32.totalorder %s22_s19, %s552_s27  ;;  %p558_p5 = scmp.lt.s32.totalorder %s552_s27, %s552_s27 }
   0xb   :  { %p559_p6 = por %p558_p5, %p557_p4 }
   0xd   :  { %p560_p7 = pnand %p559_p6, %p553_p3 }
   0xf   :  { %563 = shalt.err (!%p560_p7)
}
  0x10   :  { %s591_s28 = smov 64   ;;  %s592_s29 = smov 4  }
  0x11   :  { %27 = dma.hbm_to_vmem [thread:$0]  %s757_s2, 1536, %s22_s19, [#allocation3], %s591_s28, %s591_s28, %s592_s29  }
  0x12   :  { %586 = dma.done.wait [#allocation3], 1536  }
  0x13   :  { %587 = vsyncadd [#allocation3], 4294965760  ;;  %v593_v0 = vmov 0   ;;  %v514_v1 = vld [vmem:[%s756_s1 + $0x4] ss:$8 sps:$4 sm:$0xff]   ;;  %vm80_vm0 = vcmask 261120   ;;  %v50_v7 = vlaneseq }
  0x14   :  { %116 = vmatprep.mubr.bf16.mxu0 %v593_v0  ;;  %306 = vmatprep.subr.bf16.mxu1 %v593_v0  ;;  %v516_v2 = vld [vmem:[%s756_s1] ss:$8 sps:$4 sm:$0xff]   ;;  %v517_v3 = vld [vmem:[%s756_s1 + $0x14] ss:$8 sps:$4 sm:$0xff]   ;;  %v519_v4 = vld [vmem:[%s756_s1 + $0x10] ss:$8 sps:$4 sm:$0xff]  }
  0x15   :  { %84 = vmatprep.subr.bf16.mxu0 %v514_v1  ;;  %v43_v5 = vld [vmem:[%s755_s0] sm:$0xf]  ;;  %v51_v8 = vshrl.u32 %v50_v7, 7  ;;  %vm127_vm1 = vcmask 519168   ;;  %v521_v25 = vld [vmem:[#allocation2 + $0x8] sm:$0xff]   ;;  %v522_v26 = vld [vmem:[#allocation2 + $0x10] sm:$0xff]  }
  0x16   :  { %85 = vmatpush1.bf16.msra.mxu0 %v516_v2  ;;  %v44_v6 = vpack.c.bf16 %v43_v5, %v43_v5  ;;  %v36_v10 = vld [vmem:[%s759_s4] ss:$8 sm:$0x3]  ;;  %v523_v33 = vld [vmem:[#allocation2 + $0x18] sm:$0xff]   ;;  %v526_v36 = vld [vmem:[#allocation2 + $0x30] sm:$0xff]   ;;  %v594_v43 = vmov 0.0  }
  0x17   :  { %86 = vmatprep.subr.bf16.mxu0 %v517_v3  ;;  %v658_v9 = vsub.s32 0, %v51_v8  ;;  %v674_v20 = vsub.s32 1, %v51_v8  ;;  %v520_v24 = vld [vmem:[#allocation2] sm:$0xff]   ;;  %v525_v35 = vld [vmem:[#allocation2 + $0x28] sm:$0xff]   ;;  %v527_v37 = vld [vmem:[#allocation2 + $0x38] sm:$0xff]   ;;  %vm166_vm2 = vcmask 523264  }
  0x18   :  { %307 = vmatpush1.bf16.msra.mxu1 %v520_v24  ;;  %v524_v34 = vld [vmem:[#allocation2 + $0x20] sm:$0xff]   ;;  %v529_v39 = vld [vmem:[#allocation2 + $0x48] sm:$0xff]   ;;  %v530_v40 = vld [vmem:[#allocation2 + $0x50] sm:$0xff]   ;;  %vm595_vm3 = vmmov 0   ;;  %vm396_vm4 = vcmask 785408   ;;  %vm440_vm5 = vcmask 191488  }
  0x19   :  { %v53_v11 = vrot.slane %v36_v10, %v658_v9  ;;  %v57_v21 = vrot.slane %v36_v10, %v674_v20  ;;  %308 = vmatprep.subr.bf16.mxu1 %v593_v0  ;;  %v528_v38 = vld [vmem:[#allocation2 + $0x40] sm:$0xff]   ;;  %v531_v41 = vld [vmem:[#allocation2 + $0x58] sm:$0xff]   ;;  %v533_v44 = vld [vmem:[%s758_s3 + $0x8] sm:$0xff]  }
  0x1a   :  { %87 = vmatpush1.bf16.msra.mxu0 %v519_v4  ;;  %v532_v42 = vld [vmem:[%s758_s3] sm:$0xff]   ;;  %v534_v45 = vld [vmem:[%s758_s3 + $0x10] sm:$0xff]   ;;  %v535_v46 = vld [vmem:[%s758_s3 + $0x18] sm:$0xff]  }
  0x1b   :  { %491 = vmatprep.subr.bf16.mxu0 %v594_v43  ;;  %v457_v4 = vld [vmem:[%s759_s4 + $0x1] ss:$8 sm:$0x3] }
  0x1c   :  { %309 = vmatpush1.bf16.msra.mxu1 %v521_v25  ;;  %v181_v8 = vrot.slane %v457_v4, %v658_v9 }
  0x1d   :  { %463 = vmatmul.mubr.msk.bf16.vlgmr.msra.gmra.mrb[0].mxu0 %vm80_vm0, %v44_v6  ;;  %310 = vmatprep.subr.bf16.mxu1 %v593_v0  ;;  %v458_v6 = vld [vmem:[%s759_s4 + $0x2] ss:$8 sm:$0x3] }
  0x1e   :  { %492 = vmatpush3.bf16.msra.mxu0 %v532_v42  ;;  %503 = vmatprep.mubr.msk.bf16.mxu0 %vm595_vm3, %v594_v43 }
  0x1f   :  { %493 = vmatprep.subr.bf16.mxu0 %v594_v43 }
  0x20   :  { %311 = vmatpush1.bf16.msra.mxu1 %v522_v26 }
  0x21   :  { %312 = vmatprep.subr.bf16.mxu1 %v593_v0 }
  0x22   :  { %494 = vmatpush3.bf16.msra.mxu0 %v533_v44 }
  0x23   :  { %495 = vmatprep.subr.bf16.mxu0 %v594_v43 }
  0x24   :  { %313 = vmatpush1.bf16.msra.mxu1 %v523_v33 }
  0x25   :  { %314 = vmatprep.subr.bf16.mxu1 %v593_v0 }
  0x26   :  { %496 = vmatpush3.bf16.msra.mxu0 %v534_v45 }
  0x27   :  { %497 = vmatprep.subr.bf16.mxu0 %v594_v43 }
  0x28   :  { %315 = vmatpush1.bf16.msra.mxu1 %v524_v34 }
  0x29   :  { %316 = vmatprep.subr.bf16.mxu1 %v593_v0 }
  0x2a   :  { %498 = vmatpush3.bf16.msra.mxu0 %v535_v46 }
  0x2b   :  { %499 = vmatprep.subr.bf16.mxu0 %v594_v43 }
  0x2c   :  { %317 = vmatpush1.bf16.msra.mxu1 %v525_v35  ;;  %v42_v35 = vld [vmem:[%s759_s4 + $0x4] ss:$0 sm:$0xff] }
  0x2d   :  { %318 = vmatprep.subr.bf16.mxu1 %v593_v0 }
  0x30   :  { %319 = vmatpush1.bf16.msra.mxu1 %v526_v36 }
  0x31   :  { %320 = vmatprep.subr.bf16.mxu1 %v593_v0 }
  0x34   :  { %321 = vmatpush1.bf16.msra.mxu1 %v527_v37 }
  0x35   :  { %322 = vmatprep.subr.bf16.mxu1 %v593_v0 }
  0x38   :  { %323 = vmatpush1.bf16.msra.mxu1 %v528_v38 }
  0x39   :  { %324 = vmatprep.subr.bf16.mxu1 %v593_v0 }
  0x3c   :  { %325 = vmatpush1.bf16.msra.mxu1 %v529_v39 }
  0x3d   :  { %326 = vmatprep.subr.bf16.mxu1 %v593_v0 }
  0x40   :  { %327 = vmatpush1.bf16.msra.mxu1 %v530_v40 }
  0x41   :  { %328 = vmatprep.subr.bf16.mxu1 %v593_v0 }
  0x44   :  { %329 = vmatpush1.bf16.msra.mxu1 %v531_v41 }
  0xf0   :  { %v118_v12 = vpop.f32.mrb[0].mxu0 }
  0xf1   :  { %v664_v13 = vadd.f32 %v118_v12, %v53_v11  ;;  %v120_v14 = vpop.f32.mrb[1].mxu0  ;;  %v194_v12 = vrot.slane %v458_v6, %v658_v9  ;;  %v536_v9 = vld [vmem:[%s758_s3 + $0x20] sm:$0xff]  }
  0xf2   :  { %v122_v15 = vpop.f32.mrb[2].mxu0  ;;  %v677_v22 = vadd.f32 %v120_v14, %v57_v21  ;;  %500 = vmatpush3.bf16.msra.mxu0 %v536_v9 }
  0xf3   :  { %v123_v16 = vpop.f32.mrb[3].mxu0  ;;  %139 = vrot.lane.b32.xlu0 %v664_v13, %s591_s28  ;;  %v128_v17 = vsel %vm127_vm1, %v664_v13, 0.0  ;;  %v125_v18 = vmul.f32 %v664_v13, %v664_v13  ;;  %v185_v15 = vrot.slane %v457_v4, %v674_v20  ;;  %501 = vmatprep.subr.bf16.mxu0 %v594_v43 }
  0xf4   :  { %129 = vadd.xlane.f32.xlu1 %v128_v17  ;;  %v156_v23 = vsel %vm127_vm1, %v677_v22, 0.0  ;;  %v126_v31 = vmul.f32 %v677_v22, %v677_v22 }
  0xf5   :  { %v132_v19 = vsel %vm127_vm1, %v125_v18, 0.0 }
  0xf6   :  { %v160_v32 = vsel %vm127_vm1, %v126_v31, 0.0 }
  0xf7   :  { %147 = vrot.lane.b32.xlu0 %v125_v18, %s591_s28 }
  0xf8   :  { %133 = vadd.xlane.f32.xlu1 %v132_v19  ;;  %v198_v19 = vrot.slane %v458_v6, %v674_v20  ;;  %v537_v20 = vld [vmem:[%s758_s3 + $0x28] sm:$0xff]   ;;  %s596_s3 = smov [#allocation5]  }
  0xf9   :  { %502 = vmatpush3.bf16.msra.mxu0 %v537_v20  ;;  %s448_s11 = sshll.u32 %s596_s3, 4  ;;  %s449_s11 = int_to_ptr.vmem [resolvable:$true] %s448_s11 }
  0xfa   :  { %s564_s12 = scalar_lea.vmem %s449_s11, 64  ;;  %p569_p9 = scmp.lt.s32.totalorder %s449_s11, %s449_s11 }
  0xfb   :  { %p565_p8 = scmp.ne.s32.totalorder %s449_s11, %s564_s12  ;;  %p570_p10 = scmp.lt.s32.totalorder %s564_s12, %s564_s12 }
  0xfd   :  { %p571_p11 = por %p570_p10, %p569_p9 }
  0xff   :  { %p572_p12 = pnand %p571_p11, %p565_p8 }
 0x116   :  { %157 = vadd.xlane.f32.xlu0 %v156_v23 }
 0x165   :  { %v140_v27 = vpop.permute.xlu0 %139 }
 0x166   :  { %v142_v28 = vsel %vm127_vm1, %v140_v27, 0.0 }
 0x167   :  { %143 = vadd.xlane.f32.xlu1 %v142_v28 }
 0x169   :  { %v148_v29 = vpop.permute.xlu0 %147 }
 0x16a   :  { %v150_v30 = vsel %vm127_vm1, %v148_v29, 0.0 }
 0x16b   :  { %151 = vadd.xlane.f32.xlu1 %v150_v30 }
 0x16f   :  { %161 = vadd.xlane.f32.xlu1 %v160_v32 }
 0x181   :  { %v130_v47 = vpop.xlane.xlu1 %129 }
 0x182   :  { %v131_v50 = vmul.f32 0.015625, %v130_v47 }
 0x184   :  { %v136_v55 = vmul.f32 %v131_v50, %v131_v50 }
 0x185   :  { %v134_v48 = vpop.xlane.xlu1 %133 }
 0x186   :  { %v135_v53 = vmul.f32 0.015625, %v134_v48 }
 0x188   :  { %v137_v59 = vsub.f32 %v135_v53, %v136_v55 }
 0x1a3   :  { %v158_v52 = vpop.xlane.xlu0 %157 }
 0x1a4   :  { %v159_v56 = vmul.f32 0.015625, %v158_v52 }
 0x1a6   :  { %v164_v62 = vmul.f32 %v159_v56, %v159_v56  ;;  %v170_v14 = vsub.f32 %v677_v22, %v159_v56  ;;  %v41_v22 = vld [vmem:[%s759_s4 + $0x3] ss:$0 sm:$0xff] }
 0x1f4   :  { %v144_v49 = vpop.xlane.xlu1 %143 }
 0x1f5   :  { %v145_v51 = vmul.f32 0.015625, %v144_v49 }
 0x1f7   :  { %v154_v57 = vmul.f32 %v145_v51, %v145_v51  ;;  %v167_v5 = vsel %vm166_vm2, %v131_v50, %v145_v51 }
 0x1f8   :  { %v152_v54 = vpop.xlane.xlu1 %151  ;;  %v169_v7 = vsub.f32 %v664_v13, %v167_v5 }
 0x1f9   :  { %v153_v58 = vmul.f32 0.015625, %v152_v54 }
 0x1fb   :  { %v155_v60 = vsub.f32 %v153_v58, %v154_v57 }
 0x1fc   :  { %v162_v61 = vpop.xlane.xlu1 %161 }
 0x1fd   :  { %v163_v63 = vmul.f32 0.015625, %v162_v61  ;;  %v168_v0 = vsel %vm166_vm2, %v137_v59, %v155_v60 }
 0x1fe   :  { %v171_v1 = vadd.f32 1e-05, %v168_v0 }
 0x1ff   :  { %v165_v2 = vsub.f32 %v163_v63, %v164_v62 }
 0x200   :  { %538 = vrsqrt.f32 %v171_v1 }
 0x201   :  { %v172_v3 = vadd.f32 1e-05, %v165_v2 }
 0x203   :  { %540 = vrsqrt.f32 %v172_v3 }
 0x20a   :  { %v539_v10 = vpop.eup %538 }
 0x20b   :  { %v175_v11 = vmul.f32 %v539_v10, %v169_v7 }
 0x20d   :  { %v541_v16 = vpop.eup %540  ;;  %v188_v17 = vmul.f32 %v181_v8, %v175_v11 }
 0x20e   :  { %v176_v18 = vmul.f32 %v541_v16, %v170_v14 }
 0x20f   :  { %v201_v21 = vadd.f32 %v194_v12, %v188_v17 }
 0x210   :  { %v189_v23 = vmul.f32 %v185_v15, %v176_v18 }
 0x211   :  { %v203_v25 = vmax.f32 %v201_v21, 0.0 }
 0x212   :  { %v202_v24 = vadd.f32 %v198_v19, %v189_v23 }
 0x213   :  { %v205_v27 = vpack.c.bf16 %v203_v25, %v203_v25 }
 0x214   :  { %v204_v13 = vmax.f32 %v202_v24, 0.0 }
 0x216   :  { %v206_v26 = vpack.c.bf16 %v204_v13, %v204_v13 }
 0x218   :  { %476 = vmatprep.mubr.msk.bf16.mxu1 %vm166_vm2, %v206_v26 }
 0x219   :  { %339 = vmatmul.mubr.bf16.vlgmr.msra.gmra.mrb[0].mxu1 %v205_v27 }
 0x2ec   :  { %v340_v28 = vpop.f32.mrb[0].mxu1 }
 0x2ed   :  { %v341_v29 = vadd.f32 %v340_v28, %v41_v22  ;;  %v342_v30 = vpop.f32.mrb[1].mxu1 }
 0x2ee   :  { %v343_v31 = vpop.f32.mrb[2].mxu1 }
 0x2ef   :  { %v346_v32 = vmax.f32 %v341_v29, 0.0  ;;  %v344_v33 = vpop.f32.mrb[3].mxu1 }
 0x2f1   :  { %v347_v34 = vpack.c.bf16 %v346_v32, %v346_v32 }
 0x2f3   :  { %504 = vmatmul.mubr.msk.bf16.vlgmr.msra.gmra.mrb[4].mxu0 %vm396_vm4, %v347_v34 }
 0x3c6   :  { %v434_v36 = vpop.f32.mrb[4].mxu0 }
 0x3c7   :  { %v435_v37 = vadd.f32 %v434_v36, %v42_v35  ;;  %v505_v38 = vpop.f32.mrb[5].mxu0 }
 0x3c8   :  { %v437_v39 = vpop.f32.mrb[6].mxu0 }
 0x3c9   :  { %v506_v40 = vpop.f32.mrb[7].mxu0  ;;  %441 = vst.msk [vmem:[#allocation5] sm:$0xf] %vm440_vm5, %v435_v37 }
 0x3ca   :  { %575 = shalt.err (!%p572_p12)
}
 0x3cb   :  { %s576_s4 = scalar_lea.hbm %s760_s5, 64 }
 0x3cc   :  { %p577_p13 = scmp.ne.s32.totalorder %s760_s5, %s576_s4  ;;  %p580_p0 = scmp.lt.u32.totalorder %s576_s4, %s760_s5 }
 0x3ce   :  { %p582_p1 = pnand %p580_p0, %p577_p13 }
 0x3d0   :  { %585 = shalt.err (!%p582_p1)
}
 0x3d1   :  { %451 = dma.vmem_to_hbm [thread:$0]  %s449_s11, 64, %s760_s5, [#allocation4]  }
 0x3d2   :  { %588 = dma.done.wait [#allocation4], 64  }
 0x3d3   :  { %589 = vsyncadd [#allocation4], 4294967232 }
 0x3d4   :  { %455 = vsyncpa [#allocation3], 1 }
 0x3d5   :  { %456 = vsyncpa [#allocation4], 1 }

</bundles_post_ra>
